<compile_context>
chip_gen: v5e
topology: v5e:2x2
jax: 0.10.0
libtpu: 0.0.40
codegen_flags: <defaults>
</compile_context>

<pallas_src>
import jax
import jax.numpy as jnp
from jax import lax
from jax.experimental import pallas as pl
from jax.experimental.pallas import tpu as pltpu


def _round_up(x, m):
    return (x + m - 1) // m * m


# ----------------------------------------------------------------------------
# Pallas kernel: one grid step = one token tile; the FULL recurrence runs
# inside a single kernel invocation (in-kernel fori_loop, h/c loop-carried).
# ----------------------------------------------------------------------------
def _lstm_kernel(x_ref, wih_ref, whh_ref, b_ref, o_ref, gx_ref):
    # x_ref  : (S, Nt, D)   bf16  merged test+support inputs (recurrence along axis 0)
    # wih_ref: (D, Gp)      bf16  gate-dense, pre-transposed input weights
    # whh_ref: (H, Gp)      bf16  gate-dense, pre-transposed hidden weights
    # b_ref  : (1, Gp)      f32   b_ih + b_hh, gate-dense
    # o_ref  : (S, Nt, H)   f32   hidden-state outputs
    # gx_ref : (S, Nt, Gp)  f32   scratch: hoisted input projection (pre-activations f32)
    S, Nt, D = x_ref.shape
    H = whh_ref.shape[0]
    Gp = whh_ref.shape[1]

    # --- Hoisted input projection: one large MXU matmul for all steps (bf16 in, f32 acc).
    x_all = x_ref[...].reshape(S * Nt, D)
    gx = jnp.dot(x_all, wih_ref[...], preferred_element_type=jnp.float32) + b_ref[...]
    gx_ref[...] = gx.reshape(S, Nt, Gp)

    whh = whh_ref[...]          # resident across the whole recurrence

    def step(t, carry):
        h, c = carry            # f32 carries
        gates = gx_ref[t] + jnp.dot(h.astype(whh.dtype), whh,
                                    preferred_element_type=jnp.float32)
        # Dense gate packing: gate g occupies lanes [g*H, (g+1)*H). At H=32 the four
        # gates fill exactly one 128-lane group (no padding waste); for H a multiple
        # of 128 the slices are lane-group aligned.
        i_g = jax.nn.sigmoid(gates[:, 0 * H:1 * H])
        f_g = jax.nn.sigmoid(gates[:, 1 * H:2 * H])
        g_g = jnp.tanh(gates[:, 2 * H:3 * H])
        o_g = jax.nn.sigmoid(gates[:, 3 * H:4 * H])
        c_new = f_g * c + i_g * g_g
        h_new = o_g * jnp.tanh(c_new)
        o_ref[t] = h_new        # stays in the VMEM output block; one HBM writeback/tile
        return h_new, c_new

    h0 = jnp.zeros((Nt, H), jnp.float32)
    c0 = jnp.zeros((Nt, H), jnp.float32)
    # Bounded partial unroll: full unroll for short S, unroll=8 at production S.
    lax.fori_loop(0, S, step, (h0, c0), unroll=min(S, 8))


def lstm_pallas(x, wih, whh, bias, *, token_tile=None):
    """x: (S, Np, D) bf16; weights gate-dense & pre-transposed.

    token_tile: tokens per grid step. Default = all tokens (one tile). At production
    sizes set it so 2+ tiles exist (v7x megacore split) and the (S, token_tile, Gp)
    f32 gx scratch stays within the per-core VMEM budget (64 MiB on v7x).
    """
    S, Np, D = x.shape
    H, Gp = whh.shape
    if token_tile is None or token_tile >= Np:
        token_tile = Np
    assert Np % token_tile == 0 and (token_tile == Np or token_tile % 8 == 0)
    num_tiles = Np // token_tile

    return pl.pallas_call(
        _lstm_kernel,
        out_shape=jax.ShapeDtypeStruct((S, Np, H), jnp.float32),
        grid_spec=pltpu.PrefetchScalarGridSpec(
            num_scalar_prefetch=0,
            grid=(num_tiles,),
            in_specs=[
                pl.BlockSpec((S, token_tile, D), lambda n: (0, n, 0)),
                pl.BlockSpec((D, Gp), lambda n: (0, 0)),
                pl.BlockSpec((H, Gp), lambda n: (0, 0)),
                pl.BlockSpec((1, Gp), lambda n: (0, 0)),
            ],
            out_specs=pl.BlockSpec((S, token_tile, H), lambda n: (0, n, 0)),
            scratch_shapes=[pltpu.VMEM((S, token_tile, Gp), jnp.float32)],
        ),
        compiler_params=pltpu.CompilerParams(
            # Token tiles are independent -> both TensorCores on v7x.
            dimension_semantics=("parallel",),
            # Keep headroom below v7x's 64 MiB physical VMEM; raise on v5e/v6e if a
            # bigger token tile is wanted.
            vmem_limit_bytes=48 * 1024 * 1024,
        ),
    )(x, wih, whh, bias)


# ----------------------------------------------------------------------------
# Parameters (transpose + gate-dense packing + bias sum hoisted here, done once)
# ----------------------------------------------------------------------------
def _pack_gates_dense(w_t, g_pad, dtype):
    # w_t: (d_in, 4H) pre-transposed weight in PyTorch gate order [i, f, g, o].
    # Gates stay dense; only the tail of the gate axis is zero-padded to g_pad (x128).
    d_in, g = w_t.shape
    out = jnp.zeros((d_in, g_pad), dtype)
    return out.at[:, :g].set(w_t.astype(dtype))


class NormalContextEmbedderParams:
    def __init__(self, key, num_token, emb_dim, compute_dtype=jnp.bfloat16):
        k_emb, k_wih, k_whh, k_bih, k_bhh = jax.random.split(key, 5)
        bound = 1.0 / jnp.sqrt(emb_dim)
        emb = jax.random.uniform(k_emb, (num_token, emb_dim), jnp.float32, -0.25, 0.25)
        self.embedding = emb.at[0].set(0.0)        # padding_idx=0 -> zero row
        self.w_ih = jax.random.uniform(k_wih, (4 * emb_dim, emb_dim), jnp.float32, -bound, bound)
        self.w_hh = jax.random.uniform(k_whh, (4 * emb_dim, emb_dim), jnp.float32, -bound, bound)
        self.b_ih = jax.random.uniform(k_bih, (4 * emb_dim,), jnp.float32, -bound, bound)
        self.b_hh = jax.random.uniform(k_bhh, (4 * emb_dim,), jnp.float32, -bound, bound)
        self.emb_dim = emb_dim
        self.compute_dtype = compute_dtype

        # Hoisted kernel-ready weights (done once, not per forward).
        H = emb_dim                                 # hidden size == emb_dim in this module
        self.G_pad = _round_up(4 * H, 128)          # 4H=128 at H=32 -> zero padding waste
        self.wih_g = _pack_gates_dense(self.w_ih.T, self.G_pad, compute_dtype)   # (E, Gp)
        self.whh_g = _pack_gates_dense(self.w_hh.T, self.G_pad, compute_dtype)   # (H, Gp)
        bias = (self.b_ih + self.b_hh)[None, :]
        self.bias_g = jnp.zeros((1, self.G_pad), jnp.float32).at[:, :4 * H].set(bias)


# ----------------------------------------------------------------------------
# NormalContextEmbedder forward
# ----------------------------------------------------------------------------
def normal_context_embedder_forward(params, test_token_ids, support_token_ids):
    """Reproduces NormalContextEmbedder.forward.

    test_token_ids    : (batch, test_len_full) int32
    support_token_ids : (batch, support_size, support_len_full) int32
    returns (test_token_reps, support_token_reps, None, None)
    """
    B, Tt = test_token_ids.shape
    _, Sup, Ts = support_token_ids.shape
    BS = B * Sup
    E = params.emb_dim
    cd = params.compute_dtype

    support_flat = support_token_ids.reshape(BS, Ts)

    # Embedding lookup (plain-JAX glue; see TODO at top about in-kernel gather).
    test_emb = params.embedding[test_token_ids]        # (B, Tt, E) f32
    support_emb = params.embedding[support_flat]       # (BS, Ts, E) f32

    # Merge test + support along the token (LSTM batch) axis: one recurrence of the
    # minimal length max(B, BS) over 2x the tokens per step. Test columns' inputs are
    # zero for t >= B and their outputs beyond step B are never read.
    # NOTE: matches PyTorch nn.LSTM (batch_first=False) applied to (B, T, E) — the
    # recurrence intentionally runs over the batch axis, as in the reference module.
    S = max(B, BS)
    N = Tt + Ts
    Np = _round_up(N, 8)                               # sublane alignment (token axis)

    x = jnp.zeros((S, Np, E), cd)
    x = x.at[:B, :Tt, :].set(test_emb.astype(cd))
    x = x.at[:BS, Tt:Tt + Ts, :].set(support_emb.astype(cd))

    out = lstm_pallas(x, params.wih_g, params.whh_g, params.bias_g)   # (S, Np, E) f32

    test_reps = out[:B, :Tt, :]
    support_reps = out[:BS, Tt:Tt + Ts, :]
    return test_reps, support_reps, None, None


# ----------------------------------------------------------------------------
# Pure-JAX reference (for correctness check)
# ----------------------------------------------------------------------------
def lstm_ref(x, w_ih, w_hh, b_ih, b_hh, compute_dtype=jnp.float32):
    """Plain-JAX single-layer LSTM over axis 0. compute_dtype mirrors the kernel's
    matmul input dtype (bf16) while keeping f32 accumulation / carries."""
    S, N, D = x.shape
    H = w_hh.shape[1]
    wih_t = w_ih.T.astype(compute_dtype)
    whh_t = w_hh.T.astype(compute_dtype)
    b = (b_ih + b_hh)[None, :].astype(jnp.float32)
    h0 = jnp.zeros((N, H), jnp.float32)
    c0 = jnp.zeros((N, H), jnp.float32)

    def step(carry, x_t):
        h, c = carry
        gates = (jnp.dot(x_t.astype(compute_dtype), wih_t, preferred_element_type=jnp.float32)
                 + jnp.dot(h.astype(compute_dtype), whh_t, preferred_element_type=jnp.float32)
                 + b)
        i = jax.nn.sigmoid(gates[:, 0 * H:1 * H])
        f = jax.nn.sigmoid(gates[:, 1 * H:2 * H])
        g = jnp.tanh(gates[:, 2 * H:3 * H])
        o = jax.nn.sigmoid(gates[:, 3 * H:4 * H])
        c_new = f * c + i * g
        h_new = o * jnp.tanh(c_new)
        return (h_new, c_new), h_new

    _, out = lax.scan(step, (h0, c0), x)
    return out


if __name__ == "__main__":
    key = jax.random.PRNGKey(0)
    k_param, k_test, k_sup = jax.random.split(key, 3)

    num_token = 50
    emb_dim = 32
    batch_size = 2
    support_size = 2
    test_len_full = 8
    support_len_full = 8

    params = NormalContextEmbedderParams(k_param, num_token, emb_dim)

    test_token_ids = jax.random.randint(
        k_test, (batch_size, test_len_full), 0, num_token, dtype=jnp.int32)
    support_token_ids = jax.random.randint(
        k_sup, (batch_size, support_size, support_len_full), 0, num_token, dtype=jnp.int32)

    test_reps, support_reps, _, _ = normal_context_embedder_forward(
        params, test_token_ids, support_token_ids)
    jax.block_until_ready((test_reps, support_reps))

    assert test_reps.shape == (batch_size, test_len_full, emb_dim)
    assert support_reps.shape == (batch_size * support_size, support_len_full, emb_dim)

    # Reference check mirroring the kernel's numerics (bf16 matmul inputs, f32 acc).
    test_emb = params.embedding[test_token_ids]
    sup_emb = params.embedding[support_token_ids.reshape(-1, support_len_full)]
    test_ref = lstm_ref(test_emb, params.w_ih, params.w_hh, params.b_ih, params.b_hh,
                        compute_dtype=jnp.bfloat16)
    sup_ref = lstm_ref(sup_emb, params.w_ih, params.w_hh, params.b_ih, params.b_hh,
                       compute_dtype=jnp.bfloat16)
    assert jnp.allclose(test_reps, test_ref, rtol=2e-3, atol=2e-3)
    assert jnp.allclose(support_reps, sup_ref, rtol=2e-3, atol=2e-3)

    # Sanity vs the full-f32 reference (looser tolerance because of bf16 matmul inputs).
    test_ref32 = lstm_ref(test_emb, params.w_ih, params.w_hh, params.b_ih, params.b_hh)
    sup_ref32 = lstm_ref(sup_emb, params.w_ih, params.w_hh, params.b_ih, params.b_hh)
    assert jnp.allclose(test_reps, test_ref32, rtol=3e-2, atol=3e-2)
    assert jnp.allclose(support_reps, sup_ref32, rtol=3e-2, atol=3e-2)

    print("KERNEL_OK")
</pallas_src>

<mosaic_0001>
module attributes {stable_mosaic.version = 11 : i64} {
  func.func @_lstm_kernel(%arg0: i32, %arg1: memref<4x16x32xbf16, #tpu.memory_space<vmem>>, %arg2: memref<32x128xbf16, #tpu.memory_space<vmem>>, %arg3: memref<32x128xbf16, #tpu.memory_space<vmem>>, %arg4: memref<1x128xf32, #tpu.memory_space<vmem>>, %arg5: memref<4x16x32xf32, #tpu.memory_space<vmem>>, %arg6: memref<4x16x128xf32, #tpu.memory_space<vmem>>) attributes {dimension_semantics = [#tpu.dimension_semantics<parallel>], iteration_bounds = array<i64: 1>, scalar_prefetch = 0 : i64, scratch_operands = 1 : i64, tpu.core_type = #tpu.core_type<tc>, window_params = [{transform_indices = @transform_0, window_bounds = array<i64: 4, 16, 32>}, {pipeline_mode = #tpu.pipeline_mode<synchronous>, transform_indices = @transform_1, window_bounds = array<i64: 32, 128>}, {pipeline_mode = #tpu.pipeline_mode<synchronous>, transform_indices = @transform_2, window_bounds = array<i64: 32, 128>}, {pipeline_mode = #tpu.pipeline_mode<synchronous>, transform_indices = @transform_3, window_bounds = array<i64: 1, 128>}, {transform_indices = @transform_4, window_bounds = array<i64: 4, 16, 32>}]} {
    %c0 = arith.constant 0 : index
    %c0_0 = arith.constant 0 : index
    %c0_1 = arith.constant 0 : index
    %0 = vector.load %arg1[%c0, %c0_0, %c0_1] : memref<4x16x32xbf16, #tpu.memory_space<vmem>>, vector<4x16x32xbf16>
    %1 = vector.shape_cast %0 : vector<4x16x32xbf16> to vector<64x32xbf16>
    %c0_2 = arith.constant 0 : index
    %c0_3 = arith.constant 0 : index
    %2 = vector.load %arg2[%c0_2, %c0_3] : memref<32x128xbf16, #tpu.memory_space<vmem>>, vector<32x128xbf16>
    %cst = arith.constant dense<0.000000e+00> : vector<64x128xf32>
    %3 = tpu.matmul %1, %2, %cst {dimension_numbers = #tpu.dot_dimension_numbers<[1], [0], [0], [1], [0, 0, 1, 1], [], []>} : vector<64x32xbf16>, vector<32x128xbf16>, vector<64x128xf32> -> vector<64x128xf32>
    %c0_4 = arith.constant 0 : index
    %c0_5 = arith.constant 0 : index
    %4 = vector.load %arg4[%c0_4, %c0_5] : memref<1x128xf32, #tpu.memory_space<vmem>>, vector<1x128xf32>
    %5 = vector.broadcast %4 : vector<1x128xf32> to vector<64x128xf32>
    %6 = arith.addf %3, %5 : vector<64x128xf32>
    %7 = vector.shape_cast %6 : vector<64x128xf32> to vector<4x16x128xf32>
    %c0_6 = arith.constant 0 : index
    %c0_7 = arith.constant 0 : index
    %c0_8 = arith.constant 0 : index
    %8 = vector.load %arg6[%c0_6, %c0_7, %c0_8] : memref<4x16x128xf32, #tpu.memory_space<vmem>>, vector<4x16x128xf32>
    tpu.vector_store %arg6[%c0_6, %c0_7, %c0_8], %7 {strides = array<i32>} : memref<4x16x128xf32, #tpu.memory_space<vmem>>, vector<4x16x128xf32>,
    %c0_9 = arith.constant 0 : index
    %c0_10 = arith.constant 0 : index
    %9 = vector.load %arg3[%c0_9, %c0_10] : memref<32x128xbf16, #tpu.memory_space<vmem>>, vector<32x128xbf16>
    %cst_11 = arith.constant 0.000000e+00 : f32
    %10 = vector.broadcast %cst_11 : f32 to vector<16x32xf32>
    %cst_12 = arith.constant 0.000000e+00 : f32
    %11 = vector.broadcast %cst_12 : f32 to vector<16x32xf32>
    %c0_i32 = arith.constant 0 : i32
    %12 = arith.index_cast %c0_i32 : i32 to index
    %c0_13 = arith.constant 0 : index
    %c0_14 = arith.constant 0 : index
    %13 = vector.load %arg6[%12, %c0_13, %c0_14] : memref<4x16x128xf32, #tpu.memory_space<vmem>>, vector<1x16x128xf32>
    %14 = vector.shape_cast %13 : vector<1x16x128xf32> to vector<16x128xf32>
    %15 = arith.truncf %10 : vector<16x32xf32> to vector<16x32xbf16>
    %cst_15 = arith.constant dense<0.000000e+00> : vector<16x128xf32>
    %16 = tpu.matmul %15, %9, %cst_15 {dimension_numbers = #tpu.dot_dimension_numbers<[1], [0], [0], [1], [0, 0, 1, 1], [], []>} : vector<16x32xbf16>, vector<32x128xbf16>, vector<16x128xf32> -> vector<16x128xf32>
    %17 = arith.addf %14, %16 : vector<16x128xf32>
    %18 = vector.extract_strided_slice %17 {offsets = [0, 0], sizes = [16, 32], strides = [1, 1]} : vector<16x128xf32> to vector<16x32xf32>
    %19 = arith.negf %18 : vector<16x32xf32>
    %20 = math.exp %19 : vector<16x32xf32>
    %cst_16 = arith.constant 1.000000e+00 : f32
    %21 = vector.broadcast %cst_16 : f32 to vector<16x32xf32>
    %22 = arith.addf %21, %20 : vector<16x32xf32>
    %23 = arith.divf %21, %22 : vector<16x32xf32>
    %24 = vector.extract_strided_slice %17 {offsets = [0, 32], sizes = [16, 32], strides = [1, 1]} : vector<16x128xf32> to vector<16x32xf32>
    %25 = arith.negf %24 : vector<16x32xf32>
    %26 = math.exp %25 : vector<16x32xf32>
    %cst_17 = arith.constant 1.000000e+00 : f32
    %27 = vector.broadcast %cst_17 : f32 to vector<16x32xf32>
    %28 = arith.addf %27, %26 : vector<16x32xf32>
    %29 = arith.divf %27, %28 : vector<16x32xf32>
    %30 = vector.extract_strided_slice %17 {offsets = [0, 64], sizes = [16, 32], strides = [1, 1]} : vector<16x128xf32> to vector<16x32xf32>
    %31 = math.tanh %30 : vector<16x32xf32>
    %32 = vector.extract_strided_slice %17 {offsets = [0, 96], sizes = [16, 32], strides = [1, 1]} : vector<16x128xf32> to vector<16x32xf32>
    %33 = arith.negf %32 : vector<16x32xf32>
    %34 = math.exp %33 : vector<16x32xf32>
    %cst_18 = arith.constant 1.000000e+00 : f32
    %35 = vector.broadcast %cst_18 : f32 to vector<16x32xf32>
    %36 = arith.addf %35, %34 : vector<16x32xf32>
    %37 = arith.divf %35, %36 : vector<16x32xf32>
    %38 = arith.mulf %29, %11 : vector<16x32xf32>
    %39 = arith.mulf %23, %31 : vector<16x32xf32>
    %40 = arith.addf %38, %39 : vector<16x32xf32>
    %41 = math.tanh %40 : vector<16x32xf32>
    %42 = arith.mulf %37, %41 : vector<16x32xf32>
    %43 = arith.index_cast %c0_i32 : i32 to index
    %c0_19 = arith.constant 0 : index
    %c0_20 = arith.constant 0 : index
    %44 = vector.load %arg5[%43, %c0_19, %c0_20] : memref<4x16x32xf32, #tpu.memory_space<vmem>>, vector<1x16x32xf32>
    %45 = vector.shape_cast %44 : vector<1x16x32xf32> to vector<16x32xf32>
    %46 = vector.shape_cast %42 : vector<16x32xf32> to vector<1x16x32xf32>
    tpu.vector_store %arg5[%43, %c0_19, %c0_20], %46 {strides = array<i32>} : memref<4x16x32xf32, #tpu.memory_space<vmem>>, vector<1x16x32xf32>,
    %c1_i32 = arith.constant 1 : i32
    %47 = arith.index_cast %c1_i32 : i32 to index
    %c0_21 = arith.constant 0 : index
    %c0_22 = arith.constant 0 : index
    %48 = vector.load %arg6[%47, %c0_21, %c0_22] : memref<4x16x128xf32, #tpu.memory_space<vmem>>, vector<1x16x128xf32>
    %49 = vector.shape_cast %48 : vector<1x16x128xf32> to vector<16x128xf32>
    %50 = arith.truncf %42 : vector<16x32xf32> to vector<16x32xbf16>
    %cst_23 = arith.constant dense<0.000000e+00> : vector<16x128xf32>
    %51 = tpu.matmul %50, %9, %cst_23 {dimension_numbers = #tpu.dot_dimension_numbers<[1], [0], [0], [1], [0, 0, 1, 1], [], []>} : vector<16x32xbf16>, vector<32x128xbf16>, vector<16x128xf32> -> vector<16x128xf32>
    %52 = arith.addf %49, %51 : vector<16x128xf32>
    %53 = vector.extract_strided_slice %52 {offsets = [0, 0], sizes = [16, 32], strides = [1, 1]} : vector<16x128xf32> to vector<16x32xf32>
    %54 = arith.negf %53 : vector<16x32xf32>
    %55 = math.exp %54 : vector<16x32xf32>
    %cst_24 = arith.constant 1.000000e+00 : f32
    %56 = vector.broadcast %cst_24 : f32 to vector<16x32xf32>
    %57 = arith.addf %56, %55 : vector<16x32xf32>
    %58 = arith.divf %56, %57 : vector<16x32xf32>
    %59 = vector.extract_strided_slice %52 {offsets = [0, 32], sizes = [16, 32], strides = [1, 1]} : vector<16x128xf32> to vector<16x32xf32>
    %60 = arith.negf %59 : vector<16x32xf32>
    %61 = math.exp %60 : vector<16x32xf32>
    %cst_25 = arith.constant 1.000000e+00 : f32
    %62 = vector.broadcast %cst_25 : f32 to vector<16x32xf32>
    %63 = arith.addf %62, %61 : vector<16x32xf32>
    %64 = arith.divf %62, %63 : vector<16x32xf32>
    %65 = vector.extract_strided_slice %52 {offsets = [0, 64], sizes = [16, 32], strides = [1, 1]} : vector<16x128xf32> to vector<16x32xf32>
    %66 = math.tanh %65 : vector<16x32xf32>
    %67 = vector.extract_strided_slice %52 {offsets = [0, 96], sizes = [16, 32], strides = [1, 1]} : vector<16x128xf32> to vector<16x32xf32>
    %68 = arith.negf %67 : vector<16x32xf32>
    %69 = math.exp %68 : vector<16x32xf32>
    %cst_26 = arith.constant 1.000000e+00 : f32
    %70 = vector.broadcast %cst_26 : f32 to vector<16x32xf32>
    %71 = arith.addf %70, %69 : vector<16x32xf32>
    %72 = arith.divf %70, %71 : vector<16x32xf32>
    %73 = arith.mulf %64, %40 : vector<16x32xf32>
    %74 = arith.mulf %58, %66 : vector<16x32xf32>
    %75 = arith.addf %73, %74 : vector<16x32xf32>
    %76 = math.tanh %75 : vector<16x32xf32>
    %77 = arith.mulf %72, %76 : vector<16x32xf32>
    %78 = arith.index_cast %c1_i32 : i32 to index
    %c0_27 = arith.constant 0 : index
    %c0_28 = arith.constant 0 : index
    %79 = vector.load %arg5[%78, %c0_27, %c0_28] : memref<4x16x32xf32, #tpu.memory_space<vmem>>, vector<1x16x32xf32>
    %80 = vector.shape_cast %79 : vector<1x16x32xf32> to vector<16x32xf32>
    %81 = vector.shape_cast %77 : vector<16x32xf32> to vector<1x16x32xf32>
    tpu.vector_store %arg5[%78, %c0_27, %c0_28], %81 {strides = array<i32>} : memref<4x16x32xf32, #tpu.memory_space<vmem>>, vector<1x16x32xf32>,
    %c2_i32 = arith.constant 2 : i32
    %82 = arith.index_cast %c2_i32 : i32 to index
    %c0_29 = arith.constant 0 : index
    %c0_30 = arith.constant 0 : index
    %83 = vector.load %arg6[%82, %c0_29, %c0_30] : memref<4x16x128xf32, #tpu.memory_space<vmem>>, vector<1x16x128xf32>
    %84 = vector.shape_cast %83 : vector<1x16x128xf32> to vector<16x128xf32>
    %85 = arith.truncf %77 : vector<16x32xf32> to vector<16x32xbf16>
    %cst_31 = arith.constant dense<0.000000e+00> : vector<16x128xf32>
    %86 = tpu.matmul %85, %9, %cst_31 {dimension_numbers = #tpu.dot_dimension_numbers<[1], [0], [0], [1], [0, 0, 1, 1], [], []>} : vector<16x32xbf16>, vector<32x128xbf16>, vector<16x128xf32> -> vector<16x128xf32>
    %87 = arith.addf %84, %86 : vector<16x128xf32>
    %88 = vector.extract_strided_slice %87 {offsets = [0, 0], sizes = [16, 32], strides = [1, 1]} : vector<16x128xf32> to vector<16x32xf32>
    %89 = arith.negf %88 : vector<16x32xf32>
    %90 = math.exp %89 : vector<16x32xf32>
    %cst_32 = arith.constant 1.000000e+00 : f32
    %91 = vector.broadcast %cst_32 : f32 to vector<16x32xf32>
    %92 = arith.addf %91, %90 : vector<16x32xf32>
    %93 = arith.divf %91, %92 : vector<16x32xf32>
    %94 = vector.extract_strided_slice %87 {offsets = [0, 32], sizes = [16, 32], strides = [1, 1]} : vector<16x128xf32> to vector<16x32xf32>
    %95 = arith.negf %94 : vector<16x32xf32>
    %96 = math.exp %95 : vector<16x32xf32>
    %cst_33 = arith.constant 1.000000e+00 : f32
    %97 = vector.broadcast %cst_33 : f32 to vector<16x32xf32>
    %98 = arith.addf %97, %96 : vector<16x32xf32>
    %99 = arith.divf %97, %98 : vector<16x32xf32>
    %100 = vector.extract_strided_slice %87 {offsets = [0, 64], sizes = [16, 32], strides = [1, 1]} : vector<16x128xf32> to vector<16x32xf32>
    %101 = math.tanh %100 : vector<16x32xf32>
    %102 = vector.extract_strided_slice %87 {offsets = [0, 96], sizes = [16, 32], strides = [1, 1]} : vector<16x128xf32> to vector<16x32xf32>
    %103 = arith.negf %102 : vector<16x32xf32>
    %104 = math.exp %103 : vector<16x32xf32>
    %cst_34 = arith.constant 1.000000e+00 : f32
    %105 = vector.broadcast %cst_34 : f32 to vector<16x32xf32>
    %106 = arith.addf %105, %104 : vector<16x32xf32>
    %107 = arith.divf %105, %106 : vector<16x32xf32>
    %108 = arith.mulf %99, %75 : vector<16x32xf32>
    %109 = arith.mulf %93, %101 : vector<16x32xf32>
    %110 = arith.addf %108, %109 : vector<16x32xf32>
    %111 = math.tanh %110 : vector<16x32xf32>
    %112 = arith.mulf %107, %111 : vector<16x32xf32>
    %113 = arith.index_cast %c2_i32 : i32 to index
    %c0_35 = arith.constant 0 : index
    %c0_36 = arith.constant 0 : index
    %114 = vector.load %arg5[%113, %c0_35, %c0_36] : memref<4x16x32xf32, #tpu.memory_space<vmem>>, vector<1x16x32xf32>
    %115 = vector.shape_cast %114 : vector<1x16x32xf32> to vector<16x32xf32>
    %116 = vector.shape_cast %112 : vector<16x32xf32> to vector<1x16x32xf32>
    tpu.vector_store %arg5[%113, %c0_35, %c0_36], %116 {strides = array<i32>} : memref<4x16x32xf32, #tpu.memory_space<vmem>>, vector<1x16x32xf32>,
    %c3_i32 = arith.constant 3 : i32
    %117 = arith.index_cast %c3_i32 : i32 to index
    %c0_37 = arith.constant 0 : index
    %c0_38 = arith.constant 0 : index
    %118 = vector.load %arg6[%117, %c0_37, %c0_38] : memref<4x16x128xf32, #tpu.memory_space<vmem>>, vector<1x16x128xf32>
    %119 = vector.shape_cast %118 : vector<1x16x128xf32> to vector<16x128xf32>
    %120 = arith.truncf %112 : vector<16x32xf32> to vector<16x32xbf16>
    %cst_39 = arith.constant dense<0.000000e+00> : vector<16x128xf32>
    %121 = tpu.matmul %120, %9, %cst_39 {dimension_numbers = #tpu.dot_dimension_numbers<[1], [0], [0], [1], [0, 0, 1, 1], [], []>} : vector<16x32xbf16>, vector<32x128xbf16>, vector<16x128xf32> -> vector<16x128xf32>
    %122 = arith.addf %119, %121 : vector<16x128xf32>
    %123 = vector.extract_strided_slice %122 {offsets = [0, 0], sizes = [16, 32], strides = [1, 1]} : vector<16x128xf32> to vector<16x32xf32>
    %124 = arith.negf %123 : vector<16x32xf32>
    %125 = math.exp %124 : vector<16x32xf32>
    %cst_40 = arith.constant 1.000000e+00 : f32
    %126 = vector.broadcast %cst_40 : f32 to vector<16x32xf32>
    %127 = arith.addf %126, %125 : vector<16x32xf32>
    %128 = arith.divf %126, %127 : vector<16x32xf32>
    %129 = vector.extract_strided_slice %122 {offsets = [0, 32], sizes = [16, 32], strides = [1, 1]} : vector<16x128xf32> to vector<16x32xf32>
    %130 = arith.negf %129 : vector<16x32xf32>
    %131 = math.exp %130 : vector<16x32xf32>
    %cst_41 = arith.constant 1.000000e+00 : f32
    %132 = vector.broadcast %cst_41 : f32 to vector<16x32xf32>
    %133 = arith.addf %132, %131 : vector<16x32xf32>
    %134 = arith.divf %132, %133 : vector<16x32xf32>
    %135 = vector.extract_strided_slice %122 {offsets = [0, 64], sizes = [16, 32], strides = [1, 1]} : vector<16x128xf32> to vector<16x32xf32>
    %136 = math.tanh %135 : vector<16x32xf32>
    %137 = vector.extract_strided_slice %122 {offsets = [0, 96], sizes = [16, 32], strides = [1, 1]} : vector<16x128xf32> to vector<16x32xf32>
    %138 = arith.negf %137 : vector<16x32xf32>
    %139 = math.exp %138 : vector<16x32xf32>
    %cst_42 = arith.constant 1.000000e+00 : f32
    %140 = vector.broadcast %cst_42 : f32 to vector<16x32xf32>
    %141 = arith.addf %140, %139 : vector<16x32xf32>
    %142 = arith.divf %140, %141 : vector<16x32xf32>
    %143 = arith.mulf %134, %110 : vector<16x32xf32>
    %144 = arith.mulf %128, %136 : vector<16x32xf32>
    %145 = arith.addf %143, %144 : vector<16x32xf32>
    %146 = math.tanh %145 : vector<16x32xf32>
    %147 = arith.mulf %142, %146 : vector<16x32xf32>
    %148 = arith.index_cast %c3_i32 : i32 to index
    %c0_43 = arith.constant 0 : index
    %c0_44 = arith.constant 0 : index
    %149 = vector.load %arg5[%148, %c0_43, %c0_44] : memref<4x16x32xf32, #tpu.memory_space<vmem>>, vector<1x16x32xf32>
    %150 = vector.shape_cast %149 : vector<1x16x32xf32> to vector<16x32xf32>
    %151 = vector.shape_cast %147 : vector<16x32xf32> to vector<1x16x32xf32>
    tpu.vector_store %arg5[%148, %c0_43, %c0_44], %151 {strides = array<i32>} : memref<4x16x32xf32, #tpu.memory_space<vmem>>, vector<1x16x32xf32>,
    %c4_i32 = arith.constant 4 : i32
    return
  }
  func.func @transform_0(%arg0: i32) -> (i32, i32, i32) {
    %c0_i32 = arith.constant 0 : i32
    %c0_i32_0 = arith.constant 0 : i32
    %c0_i32_1 = arith.constant 0 : i32
    return %c0_i32, %arg0, %c0_i32_0 : i32, i32, i32
  }
  func.func @transform_1(%arg0: i32) -> (i32, i32) {
    %c0_i32 = arith.constant 0 : i32
    %c0_i32_0 = arith.constant 0 : i32
    %c0_i32_1 = arith.constant 0 : i32
    return %c0_i32, %c0_i32_0 : i32, i32
  }
  func.func @transform_2(%arg0: i32) -> (i32, i32) {
    %c0_i32 = arith.constant 0 : i32
    %c0_i32_0 = arith.constant 0 : i32
    %c0_i32_1 = arith.constant 0 : i32
    return %c0_i32, %c0_i32_0 : i32, i32
  }
  func.func @transform_3(%arg0: i32) -> (i32, i32) {
    %c0_i32 = arith.constant 0 : i32
    %c0_i32_0 = arith.constant 0 : i32
    %c0_i32_1 = arith.constant 0 : i32
    return %c0_i32, %c0_i32_0 : i32, i32
  }
  func.func @transform_4(%arg0: i32) -> (i32, i32, i32) {
    %c0_i32 = arith.constant 0 : i32
    %c0_i32_0 = arith.constant 0 : i32
    %c0_i32_1 = arith.constant 0 : i32
    return %c0_i32, %arg0, %c0_i32_0 : i32, i32, i32
  }
}

</mosaic_0001>

<bundles_post_ra>
// kernel: tpu_custom_call.1
= control target key start
LH: loop header
LB: loop body
LE: loop exit
PB: predicated region body
PF: predicated region fallthrough
CT: control target
= control target key end

     0   :  { %9 = vsyncpa [#allocation4], 0  ;;  %s1050_s0 = inlined_call_operand.hbm [shape: bf16[4,16,32], index: 0, kind: input, shape index: {}]   ;;  %s1051_s1 = inlined_call_operand.hbm [shape: bf16[32,128], index: 1, kind: input, shape index: {}]   ;;  %s1052_s2 = inlined_call_operand.hbm [shape: bf16[32,128], index: 2, kind: input, shape index: {}]   ;;  %s1053_s3 = inlined_call_operand.vmem [shape: f32[1,128], index: 3, kind: input, shape index: {}]   ;;  %s1054_s4 = inlined_call_operand.hbm [shape: f32[4,16,32], index: 4, kind: output, shape index: {}]  }
   0x1   :  { %10 = vsyncpa [#allocation7], 0 }
   0x2   :  { %11 = vsyncpa [#allocation5], 0  ;;  %s29_s17 = sshll.u32 %s1051_s1, 4  ;;  %s874_s18 = smov [#allocation6]   ;;  %s30_s17 = int_to_ptr.hbm [resolvable:$true] %s29_s17 }
   0x3   :  { %s31_s19 = sshll.u32 %s874_s18, 4  ;;  %s16_s22 = sshll.u32 %s1050_s0, 4  ;;  %s32_s19 = int_to_ptr.vmem [resolvable:$true] %s31_s19  ;;  %s17_s22 = int_to_ptr.hbm [resolvable:$true] %s16_s22 }
   0x4   :  { %s875_s23 = smov 64   ;;  %s876_s24 = smov 4  }
   0x5   :  { %37 = dma.hbm_to_vmem [thread:$0]  %s30_s17, 256, %s32_s19, [#allocation7], %s875_s23, %s875_s23, %s876_s24  }
   0x6   :  { %s877_s25 = smov [#allocation3]   ;;  %s42_s1 = sshll.u32 %s1052_s2, 4  ;;  %s43_s1 = int_to_ptr.hbm [resolvable:$true] %s42_s1 }
   0x7   :  { %s18_s26 = sshll.u32 %s877_s25, 4  ;;  %s878_s29 = smov [#allocation8]   ;;  %s19_s26 = int_to_ptr.vmem [resolvable:$true] %s18_s26 }
   0x8   :  { %24 = dma.hbm_to_vmem [thread:$0]  %s17_s22, 512, %s19_s26, [#allocation4], %s875_s23, %s875_s23, %s876_s24  }
   0x9   :  { %s44_s30 = sshll.u32 %s878_s29, 4  ;;  %s45_s30 = int_to_ptr.vmem [resolvable:$true] %s44_s30 }
   0xa   :  { %50 = dma.hbm_to_vmem [thread:$0]  %s43_s1, 256, %s45_s30, [#allocation7], %s875_s23, %s875_s23, %s876_s24  }
   0xb   :  { %868 = dma.done.wait [#allocation4], 512  }
   0xc   :  { %869 = vsyncadd [#allocation4], 4294966784 }
   0xd   :  { %870 = dma.done.wait [#allocation7], 512  }
   0xe   :  { %871 = vsyncadd [#allocation7], 4294966784  ;;  %v690_v0 = vld [vmem:[#allocation6 + $0x8] sm:$0xff]  ;;  %v692_v1 = vld [vmem:[#allocation8 + $0x8] sm:$0xff]  ;;  %vm114_vm0 = vcmask 261120   ;;  %v879_v5 = vmov 0  }
   0xf   :  { %133 = vmatpush.bf16.msra.mxu0 %v690_v0  ;;  %191 = vmatpush.bf16.msra.mxu1 %v692_v1  ;;  %v689_v2 = vld [vmem:[#allocation6] sm:$0xff]  ;;  %v691_v3 = vld [vmem:[#allocation8] sm:$0xff]  ;;  %v686_v56 = vld [vmem:[#allocation3 + $0x8] sm:$0xff]  ;;  %s881_s5 = smov [#allocation9]   ;;  %s624_s9 = sshll.u32 %s1054_s4, 4  ;;  %s625_s9 = int_to_ptr.hbm [resolvable:$true] %s624_s9 }
  0x10   :  { %693 = vmatpush.bf16.msra.mxu2 %v690_v0  ;;  %694 = vmatpush.bf16.msra.mxu3 %v690_v0  ;;  %v685_v4 = vld [vmem:[#allocation3] sm:$0xff]  ;;  %v687_v55 = vld [vmem:[#allocation3 + $0x10] sm:$0xff]  ;;  %s622_s6 = sshll.u32 %s881_s5, 4  ;;  %s882_s10 = smov 128   ;;  %s623_s6 = int_to_ptr.vmem [resolvable:$true] %s622_s6 }
  0x11   :  { %v928_v6 = vld [vmem:[%s1053_s3] ss:$0 sm:$0xff]  ;;  %s880_s3 = smov 32   ;;  %s883_s11 = smov 8  }
  0x13   :  { %134 = vmatpush.bf16.msra.mxu0 %v689_v2  ;;  %192 = vmatpush.bf16.msra.mxu1 %v691_v3 }
  0x14   :  { %695 = vmatpush.bf16.msra.mxu2 %v689_v2  ;;  %696 = vmatpush.bf16.msra.mxu3 %v689_v2 }
  0x16   :  { %662 = vmatmul.msk.bf16.vlgmr.msra.gmra.mxu0 %vm114_vm0, %v685_v4  ;;  %193 = vmatmul.bf16.vlgmr.msra.gmra.mxu1 %v879_v5 }
  0x17   :  { %523 = vmatpush.bf16.msrb.mxu1 %v692_v1  ;;  %664 = vmatmul.msk.bf16.vlgmr.msra.gmra.mxu2 %vm114_vm0, %v687_v55 }
  0x18   :  { %301 = vmatpush.bf16.msrb.mxu2 %v692_v1  ;;  %412 = vmatpush.bf16.msrb.mxu3 %v692_v1 }
  0x1b   :  { %524 = vmatpush.bf16.msrb.mxu1 %v691_v3 }
  0x1c   :  { %302 = vmatpush.bf16.msrb.mxu2 %v691_v3  ;;  %413 = vmatpush.bf16.msrb.mxu3 %v691_v3 }
  0x26   :  { %663 = vmatmul.msk.bf16.gmra.mxu0 %vm114_vm0, %v686_v56 }
  0x93   :  { %v136_v7 = vpop.f32.mrf.mxu0  ;;  %v194_v8 = vpop.f32.mrf.mxu1 }
  0x94   :  { %v137_v9 = vadd.f32 %v928_v6, %v136_v7 }
  0x96   :  { %v199_v10 = vadd.f32 %v194_v8, %v137_v9 }
  0x98   :  { %708 = vtanh.f32 %v199_v10  ;;  %v674_v17 = vmul.f32 -1.442695, %v199_v10 }
  0x9a   :  { %v954_v63 = vpop.f32.mrf.mxu2 }
  0x9b   :  { %v138_v11 = vpop.f32.mrf.mxu0  ;;  %v196_v13 = vpop.f32.mrf.mxu1 }
  0x9c   :  { %v139_v12 = vadd.f32 %v928_v6, %v138_v11 }
  0x9e   :  { %v709_v14 = vpop.eup %708  ;;  %v200_v15 = vadd.f32 %v196_v13, %v139_v12 }
  0x9f   :  { %245 = vrot.lane.b32.xlu0 %v709_v14, %s875_s23 }
  0xa0   :  { %710 = vtanh.f32 %v200_v15  ;;  %v675_v18 = vmul.f32 -1.442695, %v200_v15 }
  0xa1   :  { %712 = vpow2.f32 %v674_v17 }
  0xa2   :  { %714 = vpow2.f32 %v675_v18  ;;  %v956_v0 = vpop.f32.mrf.mxu2 }
  0xa3   :  { %v141_v1 = vpop.f32.mrf.mxu0 }
  0xa4   :  { %v142_v2 = vadd.f32 %v928_v6, %v141_v1 }
  0xa6   :  { %v711_v16 = vpop.eup %710 }
  0xa7   :  { %247 = vrot.lane.b32.xlu0 %v711_v16, %s875_s23  ;;  %v713_v19 = vpop.eup %712 }
  0xa8   :  { %v207_v20 = vadd.f32 1.0, %v713_v19  ;;  %v715_v21 = vpop.eup %714 }
  0xa9   :  { %v208_v22 = vadd.f32 1.0, %v715_v21 }
  0xaa   :  { %716 = vrcp.f32 %v207_v20  ;;  %v220_v31 = vand.u32 2147483648, %v207_v20  ;;  %vm214_vm2 = vweird.f32 %v207_v20  ;;  %v218_v32 = vand.u32 2147483647, %v207_v20 }
  0xab   :  { %718 = vrcp.f32 %v208_v22  ;;  %v235_v40 = vand.u32 2147483648, %v208_v22  ;;  %vm229_vm6 = vweird.f32 %v208_v22  ;;  %v233_v41 = vand.u32 2147483647, %v208_v22  ;;  %v143_v5 = vpop.f32.mrf.mxu0 }
  0xac   :  { %v221_v35 = vor.u32 1.1754944e-38, %v220_v31  ;;  %vm219_vm4 = vcmp.eq.f32.partialorder %v218_v32, 8.507059e+37  ;;  %v144_v7 = vadd.f32 %v928_v6, %v143_v5 }
  0xad   :  { %v236_v43 = vor.u32 1.1754944e-38, %v235_v40  ;;  %vm234_vm8 = vcmp.eq.f32.partialorder %v233_v41, 8.507059e+37 }
  0xb0   :  { %v717_v23 = vpop.eup %716 }
  0xb1   :  { %v210_v24 = vmul.f32 %v717_v23, %v207_v20  ;;  %v719_v26 = vpop.eup %718  ;;  %vm215_vm1 = vweird.f32 %v717_v23 }
  0xb2   :  { %v225_v28 = vmul.f32 %v719_v26, %v208_v22  ;;  %vm216_vm3 = vmor %vm214_vm2, %vm215_vm1  ;;  %vm230_vm5 = vweird.f32 %v719_v26 }
  0xb3   :  { %v211_v25 = vsub.f32 1.0, %v210_v24  ;;  %vm231_vm7 = vmor %vm229_vm6, %vm230_vm5 }
  0xb4   :  { %v226_v30 = vsub.f32 1.0, %v225_v28 }
  0xb5   :  { %v212_v27 = vmul.f32 %v717_v23, %v211_v25 }
  0xb6   :  { %v227_v34 = vmul.f32 %v719_v26, %v226_v30 }
  0xb7   :  { %v213_v29 = vadd.f32 %v717_v23, %v212_v27 }
  0xb8   :  { %v228_v39 = vadd.f32 %v719_v26, %v227_v34 }
  0xb9   :  { %v217_v33 = vsel %vm216_vm3, %v717_v23, %v213_v29 }
  0xba   :  { %v222_v37 = vsel %vm219_vm4, %v221_v35, %v217_v33  ;;  %v232_v42 = vsel %vm231_vm7, %v719_v26, %v228_v39 }
  0xbb   :  { %v237_v44 = vsel %vm234_vm8, %v236_v43, %v232_v42  ;;  %v241_v47 = vmul.f32 0.0, %v222_v37 }
  0xbc   :  { %v242_v50 = vmul.f32 0.0, %v237_v44 }
 0x111   :  { %v246_v36 = vpop.permute.xlu0 %245 }
 0x112   :  { %v251_v38 = vmul.f32 %v246_v36, %v222_v37 }
 0x114   :  { %255 = vrot.lane.b32.xlu1 %v251_v38, %s880_s3 }
 0x119   :  { %v248_v45 = vpop.permute.xlu0 %247 }
 0x11a   :  { %v252_v46 = vmul.f32 %v248_v45, %v237_v44 }
 0x11c   :  { %257 = vrot.lane.b32.xlu1 %v252_v46, %s880_s3 }
 0x186   :  { %v256_v48 = vpop.permute.xlu1 %255 }
 0x187   :  { %v936_v49 = vadd.f32 %v256_v48, %v241_v47 }
 0x189   :  { %720 = vtanh.f32 %v936_v49 }
 0x18e   :  { %v258_v51 = vpop.permute.xlu1 %257 }
 0x18f   :  { %v721_v52 = vpop.eup %720  ;;  %v939_v53 = vadd.f32 %v258_v51, %v242_v50  ;;  %v688_v51 = vld [vmem:[#allocation3 + $0x18] sm:$0xff] }
 0x190   :  { %267 = vrot.lane.b32.xlu2 %v721_v52, %s875_s23  ;;  %665 = vmatmul.msk.bf16.vlgmr.msra.gmra.mxu3 %vm114_vm0, %v688_v51 }
 0x191   :  { %722 = vtanh.f32 %v939_v53 }
 0x197   :  { %v723_v54 = vpop.eup %722 }
 0x198   :  { %269 = vrot.lane.b32.xlu2 %v723_v54, %s875_s23 }
 0x1ea   :  { %v268_v57 = vpop.permute.xlu2 %267 }
 0x1eb   :  { %v946_v59 = vmul.f32 %v268_v57, %v222_v37 }
 0x1f2   :  { %v270_v58 = vpop.permute.xlu2 %269 }
 0x1f3   :  { %v948_v60 = vmul.f32 %v270_v58, %v237_v44 }
 0x1f5   :  { %v288_v61 = vpack.c.bf16 %v948_v60, %v946_v59 }
 0x1f7   :  { %290 = vrot.lane.b32.xlu0 %v288_v61, %s880_s3  ;;  %v147_v61 = vadd.f32 %v928_v6, %v954_v63 }
 0x213   :  { %v983_v57 = vpop.f32.mrf.mxu3 }
 0x214   :  { %v152_v51 = vadd.f32 %v928_v6, %v983_v57 }
 0x21b   :  { %v985_v58 = vpop.f32.mrf.mxu3 }
 0x269   :  { %v291_v62 = vpop.permute.xlu0 %290 }
 0x26a   :  { %676 = vmatmul.msk.bf16.vlgmr.msrb.gmra.mxu2 %vm114_vm0, %v291_v62 }
 0x2ed   :  { %v304_v3 = vpop.f32.mrf.mxu2 }
 0x2ee   :  { %v309_v4 = vadd.f32 %v304_v3, %v142_v2  ;;  %v149_v2 = vadd.f32 %v928_v6, %v956_v0 }
 0x2f0   :  { %724 = vtanh.f32 %v309_v4  ;;  %v677_v15 = vmul.f32 -1.442695, %v309_v4 }
 0x2f5   :  { %v306_v8 = vpop.f32.mrf.mxu2 }
 0x2f6   :  { %v725_v9 = vpop.eup %724  ;;  %v310_v10 = vadd.f32 %v306_v8, %v144_v7 }
 0x2f7   :  { %355 = vrot.lane.b32.xlu1 %v725_v9, %s875_s23 }
 0x2f8   :  { %726 = vtanh.f32 %v310_v10  ;;  %v678_v12 = vmul.f32 -1.442695, %v310_v10 }
 0x2fa   :  { %728 = vpow2.f32 %v678_v12 }
 0x2fe   :  { %v727_v11 = vpop.eup %726 }
 0x2ff   :  { %357 = vrot.lane.b32.xlu2 %v727_v11, %s875_s23 }
 0x300   :  { %v729_v13 = vpop.eup %728 }
 0x301   :  { %v318_v14 = vadd.f32 1.0, %v729_v13 }
 0x303   :  { %730 = vrcp.f32 %v318_v14  ;;  %v345_v24 = vand.u32 2147483648, %v318_v14  ;;  %vm339_vm10 = vweird.f32 %v318_v14  ;;  %v343_v25 = vand.u32 2147483647, %v318_v14 }
 0x304   :  { %732 = vpow2.f32 %v677_v15 }
 0x305   :  { %v346_v28 = vor.u32 1.1754944e-38, %v345_v24  ;;  %vm344_vm12 = vcmp.eq.f32.partialorder %v343_v25, 8.507059e+37 }
 0x309   :  { %v731_v16 = vpop.eup %730 }
 0x30a   :  { %v733_v17 = vpop.eup %732  ;;  %v335_v18 = vmul.f32 %v731_v16, %v318_v14  ;;  %vm340_vm9 = vweird.f32 %v731_v16 }
 0x30b   :  { %v317_v19 = vadd.f32 1.0, %v733_v17  ;;  %vm341_vm11 = vmor %vm339_vm10, %vm340_vm9 }
 0x30c   :  { %v336_v20 = vsub.f32 1.0, %v335_v18 }
 0x30d   :  { %734 = vrcp.f32 %v317_v19  ;;  %v330_v35 = vand.u32 2147483648, %v317_v19  ;;  %vm324_vm14 = vweird.f32 %v317_v19  ;;  %v328_v36 = vand.u32 2147483647, %v317_v19 }
 0x30e   :  { %v337_v21 = vmul.f32 %v731_v16, %v336_v20 }
 0x30f   :  { %v331_v38 = vor.u32 1.1754944e-38, %v330_v35  ;;  %vm329_vm1 = vcmp.eq.f32.partialorder %v328_v36, 8.507059e+37 }
 0x310   :  { %v338_v22 = vadd.f32 %v731_v16, %v337_v21 }
 0x312   :  { %v342_v26 = vsel %vm341_vm11, %v731_v16, %v338_v22 }
 0x313   :  { %v735_v23 = vpop.eup %734  ;;  %v347_v30 = vsel %vm344_vm12, %v346_v28, %v342_v26 }
 0x314   :  { %v320_v27 = vmul.f32 %v735_v23, %v317_v19  ;;  %vm325_vm13 = vweird.f32 %v735_v23  ;;  %v352_v42 = vmul.f32 %v347_v30, %v939_v53 }
 0x315   :  { %vm326_vm15 = vmor %vm324_vm14, %vm325_vm13 }
 0x316   :  { %v321_v32 = vsub.f32 1.0, %v320_v27 }
 0x318   :  { %v322_v33 = vmul.f32 %v735_v23, %v321_v32 }
 0x31a   :  { %v323_v34 = vadd.f32 %v735_v23, %v322_v33 }
 0x31c   :  { %v327_v37 = vsel %vm326_vm15, %v735_v23, %v323_v34 }
 0x31d   :  { %v332_v40 = vsel %vm329_vm1, %v331_v38, %v327_v37 }
 0x31e   :  { %v351_v46 = vmul.f32 %v332_v40, %v936_v49 }
 0x359   :  { %v358_v29 = vpop.permute.xlu2 %357 }
 0x35a   :  { %v362_v31 = vmul.f32 %v358_v29, %v347_v30 }
 0x35c   :  { %367 = vrot.lane.b32.xlu1 %v362_v31, %s880_s3 }
 0x369   :  { %v356_v39 = vpop.permute.xlu1 %355 }
 0x36a   :  { %v361_v41 = vmul.f32 %v356_v39, %v332_v40 }
 0x36c   :  { %365 = vrot.lane.b32.xlu0 %v361_v41, %s880_s3 }
 0x3ce   :  { %v368_v43 = vpop.permute.xlu1 %367 }
 0x3cf   :  { %v965_v44 = vadd.f32 %v368_v43, %v352_v42 }
 0x3d1   :  { %736 = vtanh.f32 %v965_v44 }
 0x3d7   :  { %v737_v45 = vpop.eup %736 }
 0x3d8   :  { %379 = vrot.lane.b32.xlu0 %v737_v45, %s875_s23 }
 0x3de   :  { %v366_v47 = vpop.permute.xlu0 %365 }
 0x3df   :  { %v970_v48 = vadd.f32 %v366_v47, %v351_v46 }
 0x3e1   :  { %738 = vtanh.f32 %v970_v48 }
 0x3e7   :  { %v739_v50 = vpop.eup %738 }
 0x3e8   :  { %377 = vrot.lane.b32.xlu2 %v739_v50, %s875_s23 }
 0x442   :  { %v378_v52 = vpop.permute.xlu2 %377 }
 0x443   :  { %v975_v54 = vmul.f32 %v378_v52, %v332_v40 }
 0x44a   :  { %v380_v53 = vpop.permute.xlu0 %379 }
 0x44b   :  { %v977_v55 = vmul.f32 %v380_v53, %v347_v30 }
 0x44d   :  { %v399_v49 = vpack.c.bf16 %v977_v55, %v975_v54 }
 0x44f   :  { %401 = vrot.lane.b32.xlu1 %v399_v49, %s880_s3  ;;  %v154_v49 = vadd.f32 %v928_v6, %v985_v58 }
 0x4c1   :  { %v402_v56 = vpop.permute.xlu1 %401 }
 0x4c2   :  { %679 = vmatmul.msk.bf16.vlgmr.msrb.gmra.mxu3 %vm114_vm0, %v402_v56 }
 0x545   :  { %v415_v62 = vpop.f32.mrf.mxu3 }
 0x546   :  { %v420_v1 = vadd.f32 %v415_v62, %v147_v61 }
 0x548   :  { %740 = vtanh.f32 %v420_v1  ;;  %v680_v8 = vmul.f32 -1.442695, %v420_v1 }
 0x54d   :  { %v417_v3 = vpop.f32.mrf.mxu3 }
 0x54e   :  { %v741_v4 = vpop.eup %740  ;;  %v421_v5 = vadd.f32 %v417_v3, %v149_v2 }
 0x54f   :  { %466 = vrot.lane.b32.xlu2 %v741_v4, %s875_s23 }
 0x550   :  { %742 = vtanh.f32 %v421_v5  ;;  %v681_v13 = vmul.f32 -1.442695, %v421_v5 }
 0x551   :  { %744 = vpow2.f32 %v680_v8 }
 0x556   :  { %v743_v7 = vpop.eup %742 }
 0x557   :  { %468 = vrot.lane.b32.xlu0 %v743_v7, %s875_s23  ;;  %v745_v9 = vpop.eup %744 }
 0x558   :  { %v428_v10 = vadd.f32 1.0, %v745_v9 }
 0x55a   :  { %746 = vrcp.f32 %v428_v10  ;;  %v441_v15 = vand.u32 2147483648, %v428_v10  ;;  %vm435_vm3 = vweird.f32 %v428_v10  ;;  %v439_v16 = vand.u32 2147483647, %v428_v10 }
 0x55b   :  { %748 = vpow2.f32 %v681_v13 }
 0x55c   :  { %v442_v19 = vor.u32 1.1754944e-38, %v441_v15  ;;  %vm440_vm5 = vcmp.eq.f32.partialorder %v439_v16, 8.507059e+37 }
 0x560   :  { %v747_v63 = vpop.eup %746 }
 0x561   :  { %v431_v11 = vmul.f32 %v747_v63, %v428_v10  ;;  %vm436_vm2 = vweird.f32 %v747_v63  ;;  %v749_v17 = vpop.eup %748 }
 0x562   :  { %vm437_vm4 = vmor %vm435_vm3, %vm436_vm2  ;;  %v429_v20 = vadd.f32 1.0, %v749_v17 }
 0x563   :  { %v432_v12 = vsub.f32 1.0, %v431_v11 }
 0x564   :  { %750 = vrcp.f32 %v429_v20  ;;  %v456_v29 = vand.u32 2147483648, %v429_v20  ;;  %vm450_vm7 = vweird.f32 %v429_v20  ;;  %v454_v30 = vand.u32 2147483647, %v429_v20 }
 0x565   :  { %v433_v14 = vmul.f32 %v747_v63, %v432_v12 }
 0x566   :  { %v457_v32 = vor.u32 1.1754944e-38, %v456_v29  ;;  %vm455_vm9 = vcmp.eq.f32.partialorder %v454_v30, 8.507059e+37 }
 0x567   :  { %v434_v0 = vadd.f32 %v747_v63, %v433_v14 }
 0x569   :  { %v438_v18 = vsel %vm437_vm4, %v747_v63, %v434_v0 }
 0x56a   :  { %v443_v22 = vsel %vm440_vm5, %v442_v19, %v438_v18  ;;  %v751_v24 = vpop.eup %750 }
 0x56b   :  { %v446_v25 = vmul.f32 %v751_v24, %v429_v20  ;;  %vm451_vm6 = vweird.f32 %v751_v24  ;;  %v462_v36 = vmul.f32 %v443_v22, %v970_v48 }
 0x56c   :  { %vm452_vm8 = vmor %vm450_vm7, %vm451_vm6 }
 0x56d   :  { %v447_v26 = vsub.f32 1.0, %v446_v25 }
 0x56f   :  { %v448_v27 = vmul.f32 %v751_v24, %v447_v26 }
 0x571   :  { %v449_v28 = vadd.f32 %v751_v24, %v448_v27 }
 0x573   :  { %v453_v31 = vsel %vm452_vm8, %v751_v24, %v449_v28 }
 0x574   :  { %v458_v34 = vsel %vm455_vm9, %v457_v32, %v453_v31 }
 0x575   :  { %v463_v39 = vmul.f32 %v458_v34, %v965_v44 }
 0x5a9   :  { %v467_v21 = vpop.permute.xlu2 %466 }
 0x5aa   :  { %v472_v23 = vmul.f32 %v467_v21, %v443_v22 }
 0x5ac   :  { %476 = vrot.lane.b32.xlu1 %v472_v23, %s880_s3 }
 0x5c9   :  { %v469_v33 = vpop.permute.xlu0 %468 }
 0x5ca   :  { %v473_v35 = vmul.f32 %v469_v33, %v458_v34 }
 0x5cc   :  { %478 = vrot.lane.b32.xlu2 %v473_v35, %s880_s3 }
 0x61e   :  { %v477_v37 = vpop.permute.xlu1 %476 }
 0x61f   :  { %v996_v38 = vadd.f32 %v477_v37, %v462_v36 }
 0x621   :  { %752 = vtanh.f32 %v996_v38 }
 0x626   :  { %v479_v40 = vpop.permute.xlu2 %478 }
 0x627   :  { %v753_v41 = vpop.eup %752  ;;  %v1000_v42 = vadd.f32 %v479_v40, %v463_v39 }
 0x628   :  { %488 = vrot.lane.b32.xlu0 %v753_v41, %s875_s23 }
 0x629   :  { %754 = vtanh.f32 %v1000_v42 }
 0x62f   :  { %v755_v43 = vpop.eup %754 }
 0x630   :  { %490 = vrot.lane.b32.xlu1 %v755_v43, %s875_s23 }
 0x69a   :  { %v489_v45 = vpop.permute.xlu0 %488 }
 0x69b   :  { %v1005_v47 = vmul.f32 %v489_v45, %v443_v22 }
 0x6a2   :  { %v491_v46 = vpop.permute.xlu1 %490 }
 0x6a3   :  { %v1007_v48 = vmul.f32 %v491_v46, %v458_v34 }
 0x6a5   :  { %v510_v44 = vpack.c.bf16 %v1007_v48, %v1005_v47 }
 0x6a7   :  { %512 = vrot.lane.b32.xlu2 %v510_v44, %s880_s3 }
 0x701   :  { %v513_v50 = vpop.permute.xlu2 %512 }
 0x702   :  { %682 = vmatmul.msk.bf16.vlgmr.msrb.gmra.mxu1 %vm114_vm0, %v513_v50 }
 0x77f   :  { %v526_v52 = vpop.f32.mrf.mxu1 }
 0x780   :  { %v531_v53 = vadd.f32 %v526_v52, %v152_v51 }
 0x782   :  { %756 = vtanh.f32 %v531_v53  ;;  %v683_v2 = vmul.f32 -1.442695, %v531_v53 }
 0x787   :  { %v528_v56 = vpop.f32.mrf.mxu1 }
 0x788   :  { %v757_v61 = vpop.eup %756  ;;  %v532_v62 = vadd.f32 %v528_v56, %v154_v49 }
 0x789   :  { %577 = vrot.lane.b32.xlu0 %v757_v61, %s875_s23 }
 0x78a   :  { %758 = vtanh.f32 %v532_v62  ;;  %v684_v3 = vmul.f32 -1.442695, %v532_v62 }
 0x78b   :  { %760 = vpow2.f32 %v683_v2 }
 0x78c   :  { %762 = vpow2.f32 %v684_v3 }
 0x790   :  { %v759_v1 = vpop.eup %758 }
 0x791   :  { %579 = vrot.lane.b32.xlu1 %v759_v1, %s875_s23  ;;  %v761_v4 = vpop.eup %760 }
 0x792   :  { %v539_v57 = vadd.f32 1.0, %v761_v4  ;;  %v763_v5 = vpop.eup %762 }
 0x793   :  { %v540_v7 = vadd.f32 1.0, %v763_v5 }
 0x794   :  { %764 = vrcp.f32 %v539_v57  ;;  %v552_v13 = vand.u32 2147483648, %v539_v57  ;;  %vm546_vm11 = vweird.f32 %v539_v57  ;;  %v550_v14 = vand.u32 2147483647, %v539_v57 }
 0x795   :  { %766 = vrcp.f32 %v540_v7  ;;  %v567_v21 = vand.u32 2147483648, %v540_v7  ;;  %vm561_vm15 = vweird.f32 %v540_v7  ;;  %v565_v22 = vand.u32 2147483647, %v540_v7 }
 0x796   :  { %v553_v16 = vor.u32 1.1754944e-38, %v552_v13  ;;  %vm551_vm13 = vcmp.eq.f32.partialorder %v550_v14, 8.507059e+37 }
 0x797   :  { %v568_v24 = vor.u32 1.1754944e-38, %v567_v21  ;;  %vm566_vm2 = vcmp.eq.f32.partialorder %v565_v22, 8.507059e+37 }
 0x79a   :  { %v765_v8 = vpop.eup %764 }
 0x79b   :  { %v542_v6 = vmul.f32 %v765_v8, %v539_v57  ;;  %v767_v9 = vpop.eup %766  ;;  %vm547_vm10 = vweird.f32 %v765_v8 }
 0x79c   :  { %v557_v63 = vmul.f32 %v767_v9, %v540_v7  ;;  %vm548_vm12 = vmor %vm546_vm11, %vm547_vm10  ;;  %vm562_vm14 = vweird.f32 %v767_v9 }
 0x79d   :  { %v543_v58 = vsub.f32 1.0, %v542_v6  ;;  %vm563_vm1 = vmor %vm561_vm15, %vm562_vm14 }
 0x79e   :  { %v558_v12 = vsub.f32 1.0, %v557_v63 }
 0x79f   :  { %v544_v10 = vmul.f32 %v765_v8, %v543_v58 }
 0x7a0   :  { %v559_v15 = vmul.f32 %v767_v9, %v558_v12 }
 0x7a1   :  { %v545_v11 = vadd.f32 %v765_v8, %v544_v10 }
 0x7a2   :  { %v560_v20 = vadd.f32 %v767_v9, %v559_v15 }
 0x7a3   :  { %v549_v0 = vsel %vm548_vm12, %v765_v8, %v545_v11 }
 0x7a4   :  { %v554_v18 = vsel %vm551_vm13, %v553_v16, %v549_v0  ;;  %v564_v23 = vsel %vm563_vm1, %v767_v9, %v560_v20 }
 0x7a5   :  { %v569_v26 = vsel %vm566_vm2, %v568_v24, %v564_v23  ;;  %v573_v28 = vmul.f32 %v554_v18, %v996_v38 }
 0x7a6   :  { %v574_v32 = vmul.f32 %v569_v26, %v1000_v42 }
 0x7fb   :  { %v578_v17 = vpop.permute.xlu0 %577 }
 0x7fc   :  { %v583_v19 = vmul.f32 %v578_v17, %v554_v18 }
 0x7fe   :  { %587 = vrot.lane.b32.xlu2 %v583_v19, %s880_s3 }
 0x803   :  { %v580_v25 = vpop.permute.xlu1 %579 }
 0x804   :  { %v584_v27 = vmul.f32 %v580_v25, %v569_v26 }
 0x806   :  { %589 = vrot.lane.b32.xlu0 %v584_v27, %s880_s3 }
 0x80e   :  { %277 = vrot.lane.b32.xlu0 %v946_v59, %s880_s3 }
 0x816   :  { %389 = vrot.lane.b32.xlu0 %v977_v55, %s880_s3 }
 0x858   :  { %v588_v29 = vpop.permute.xlu2 %587 }
 0x859   :  { %v593_v30 = vadd.f32 %v588_v29, %v573_v28 }
 0x85b   :  { %768 = vtanh.f32 %v593_v30 }
 0x861   :  { %v769_v31 = vpop.eup %768 }
 0x862   :  { %599 = vrot.lane.b32.xlu1 %v769_v31, %s875_s23 }
 0x86a   :  { %279 = vrot.lane.b32.xlu1 %v948_v60, %s880_s3 }
 0x872   :  { %498 = vrot.lane.b32.xlu1 %v1005_v47, %s880_s3 }
 0x878   :  { %v590_v59 = vpop.permute.xlu0 %589 }
 0x879   :  { %v594_v33 = vadd.f32 %v590_v59, %v574_v32 }
 0x87b   :  { %770 = vtanh.f32 %v594_v33 }
 0x880   :  { %v278_v55 = vpop.permute.xlu0 %277 }
 0x881   :  { %v771_v34 = vpop.eup %770  ;;  %283 = vst.msk [vmem:[#allocation9] sm:$0xff] %vm114_vm0, %v278_v55 }
 0x882   :  { %601 = vrot.lane.b32.xlu2 %v771_v34, %s875_s23 }
 0x888   :  { %v390_v35 = vpop.permute.xlu0 %389 }
 0x889   :  { %395 = vst.msk [vmem:[#allocation9 + $0x18] sm:$0xff] %vm114_vm0, %v390_v35 }
 0x88a   :  { %387 = vrot.lane.b32.xlu2 %v975_v54, %s880_s3 }
 0x892   :  { %500 = vrot.lane.b32.xlu2 %v1007_v48, %s880_s3 }
 0x8d4   :  { %v600_v60 = vpop.permute.xlu1 %599 }
 0x8d5   :  { %v605_v36 = vmul.f32 %v600_v60, %v554_v18 }
 0x8d7   :  { %609 = vrot.lane.b32.xlu0 %v605_v36, %s880_s3 }
 0x8dc   :  { %v280_v37 = vpop.permute.xlu1 %279  ;;  %v602_v38 = vpop.permute.xlu2 %601 }
 0x8dd   :  { %284 = vst.msk [vmem:[#allocation9 + $0x8] sm:$0xff] %vm114_vm0, %v280_v37  ;;  %v606_v39 = vmul.f32 %v602_v38, %v569_v26 }
 0x8df   :  { %611 = vrot.lane.b32.xlu1 %v606_v39, %s880_s3 }
 0x8e4   :  { %v499_v40 = vpop.permute.xlu1 %498  ;;  %v388_v41 = vpop.permute.xlu2 %387 }
 0x8e5   :  { %505 = vst.msk [vmem:[#allocation9 + $0x20] sm:$0xff] %vm114_vm0, %v499_v40 }
 0x8e6   :  { %394 = vst.msk [vmem:[#allocation9 + $0x10] sm:$0xff] %vm114_vm0, %v388_v41 }
 0x8ec   :  { %v501_v54 = vpop.permute.xlu2 %500 }
 0x8ed   :  { %506 = vst.msk [vmem:[#allocation9 + $0x28] sm:$0xff] %vm114_vm0, %v501_v54 }
 0x949   :  { %v610_v42 = vpop.permute.xlu0 %609 }
 0x94a   :  { %616 = vst.msk [vmem:[#allocation9 + $0x30] sm:$0xff] %vm114_vm0, %v610_v42 }
 0x951   :  { %v612_v43 = vpop.permute.xlu1 %611 }
 0x952   :  { %617 = vst.msk [vmem:[#allocation9 + $0x38] sm:$0xff] %vm114_vm0, %v612_v43 }
 0x953   :  { %630 = dma.vmem_to_hbm [thread:$0]  %s623_s6, 1024, %s625_s9, [#allocation5], %s882_s10, %s882_s10, %s883_s11  }
 0x954   :  { %872 = dma.done.wait [#allocation5], 1024  }
 0x955   :  { %873 = vsyncadd [#allocation5], 4294966272 }
 0x956   :  { %635 = vsyncpa [#allocation4], 1 }
 0x957   :  { %636 = vsyncpa [#allocation7], 1 }
 0x958   :  { %637 = vsyncpa [#allocation5], 1 }

</bundles_post_ra>
